<compile_context>
chip_gen: v6e
topology: v6e:2x2x1
jax: 0.10.0
libtpu: 0.0.40
codegen_flags: <defaults>
</compile_context>

<pallas_src>
import jax
import jax.numpy as jnp
from jax.experimental import pallas as pl
from jax.experimental.pallas import tpu as pltpu


_IN_ROWS = 2     # feature-major input rows: x0, x1
_OUT_ROWS = 5    # packed output rows: lin1_0, lin1_1, lin2, relu, relu6
_LANES = 128
_SUBLANES = 8
_MAX_TILE_ROWS = 2048   # 2048 rows x 128 lanes = 256K elems/tile (~15 MiB dbl-buffered)


def _testforhook_kernel(params_ref, x_ref, out_ref):
    """Dense TestForHook forward for one batch tile.

    params_ref: SMEM f32[9] = [w1_00, w1_01, w1_10, w1_11, b1_0, b1_1,
                               w2_00, w2_01, b2_0]   (PyTorch (out, in) layout)
    x_ref:   VMEM f32[2, ts, 128]  -- batch over (sublane-rows, lanes)
    out_ref: VMEM f32[5, ts, 128]  -- packed outputs, same batch layout
    """
    x0 = x_ref[0]          # (ts, 128) dense slab
    x1 = x_ref[1]

    w1_00 = params_ref[0]
    w1_01 = params_ref[1]
    w1_10 = params_ref[2]
    w1_11 = params_ref[3]
    b1_0 = params_ref[4]
    b1_1 = params_ref[5]
    w2_00 = params_ref[6]
    w2_01 = params_ref[7]
    b2_0 = params_ref[8]

    # linear_1: y = x @ W1.T + b1  (K=2, N=2) -> pure VPU FMAs, no MXU.
    lin1_0 = x0 * w1_00 + x1 * w1_01 + b1_0
    lin1_1 = x0 * w1_10 + x1 * w1_11 + b1_1
    # linear_2: y = lin1 @ W2.T + b2  (K=2, N=1).
    lin2 = lin1_0 * w2_00 + lin1_1 * w2_01 + b2_0
    relu = jnp.maximum(lin2, 0.0)
    relu6 = jnp.minimum(relu, 6.0)   # relu is already >= 0

    # Full (ts, 128) unmasked stores (no partial-sublane masking).
    out_ref[0] = lin1_0
    out_ref[1] = lin1_1
    out_ref[2] = lin2
    out_ref[3] = relu
    out_ref[4] = relu6


def _round_up(n, m):
    return ((n + m - 1) // m) * m


def _choose_tile_rows(nrows):
    """Rows of 128 lanes per grid step: multiple of 8, big, >=2 steps if possible."""
    ts = min(_MAX_TILE_ROWS, nrows)
    if nrows >= 2 * _SUBLANES:
        # Keep at least 2 grid steps so v7x's two TensorCores both get work.
        ts = min(ts, _round_up(pl.cdiv(nrows, 2), _SUBLANES))
    return max(_SUBLANES, (ts // _SUBLANES) * _SUBLANES)


def test_for_hook_forward(x, w1, b1, w2, b2):
    """Pallas implementation of TestForHook.forward.

    Args:
      x:  (B, 2) float32
      w1: (2, 2) float32  -- linear_1.weight (out, in)
      b1: (2,)   float32
      w2: (1, 2) float32  -- linear_2.weight (out, in)
      b2: (1,)   float32

    Returns:
      (relu_6, layers_in, layers_out) matching the PyTorch module.
    """
    B = x.shape[0]

    # All 9 parameter scalars packed into one tiny SMEM array.
    params = jnp.concatenate(
        [w1.reshape(-1), b1.reshape(-1), w2.reshape(-1), b2.reshape(-1)]
    ).astype(jnp.float32)  # (9,)

    # Batch -> (rows, 128 lanes): pad only to a multiple of 1024 (= 8*128).
    b_pad = _round_up(max(B, 1), _SUBLANES * _LANES)
    nrows = b_pad // _LANES
    ts = _choose_tile_rows(nrows)
    grid = (pl.cdiv(nrows, ts),)

    # The one real transpose: (B, 2) -> (2, B); pad + reshape are layout-only.
    x_t = jnp.transpose(x.astype(jnp.float32))        # (2, B)
    x_t = jnp.pad(x_t, ((0, 0), (0, b_pad - B)))      # (2, b_pad)
    x_3d = x_t.reshape(_IN_ROWS, nrows, _LANES)       # (2, nrows, 128)

    out = pl.pallas_call(
        _testforhook_kernel,
        out_shape=jax.ShapeDtypeStruct((_OUT_ROWS, nrows, _LANES), jnp.float32),
        grid_spec=pltpu.PrefetchScalarGridSpec(
            num_scalar_prefetch=0,
            grid=grid,
            in_specs=[
                pl.BlockSpec(memory_space=pltpu.MemorySpace.SMEM),          # params
                pl.BlockSpec((_IN_ROWS, ts, _LANES), lambda i: (0, i, 0)),  # x tile
            ],
            out_specs=pl.BlockSpec((_OUT_ROWS, ts, _LANES), lambda i: (0, i, 0)),
        ),
        compiler_params=pltpu.CompilerParams(
            dimension_semantics=("parallel",),
        ),
    )(params, x_3d)

    # Unpack: lin1 needs a real (tiny) transpose; the rest are reshapes only.
    out2 = out.reshape(_OUT_ROWS, b_pad)
    lin1 = jnp.transpose(out2[0:2, :B])     # (B, 2)
    lin2 = out2[2, :B].reshape(B, 1)        # (B, 1)
    relu = out2[3, :B].reshape(B, 1)        # (B, 1)
    relu6 = out2[4, :B].reshape(B, 1)       # (B, 1)

    layers_in = (x, lin1, lin2)
    layers_out = (lin1, lin2, relu)
    return relu6, layers_in, layers_out


if __name__ == "__main__":
    # Parameters exactly as TestForHook.initialize(): all ones.
    w1 = jnp.ones((2, 2), dtype=jnp.float32)   # linear_1.weight
    b1 = jnp.ones((2,), dtype=jnp.float32)     # linear_1.bias
    w2 = jnp.ones((1, 2), dtype=jnp.float32)   # linear_2.weight
    b2 = jnp.ones((1,), dtype=jnp.float32)     # linear_2.bias

    def reference(xin):
        lin1 = xin @ w1.T + b1
        lin2 = lin1 @ w2.T + b2
        relu = jnp.maximum(lin2, 0.0)
        relu6 = jnp.clip(relu, 0.0, 6.0)
        return lin1, lin2, relu, relu6

    # Case 1: the module's own input x = [[0.1, 0.1], [0.1, 0.1]] (batch=2).
    x_small = jnp.full((2, 2), 0.1, dtype=jnp.float32)
    # Case 2: a modest batch that exercises padding and a 2-step parallel grid.
    key = jax.random.PRNGKey(0)
    x_big = jax.random.uniform(key, (3000, 2), dtype=jnp.float32) * 0.2

    for xin in (x_small, x_big):
        relu6, layers_in, layers_out = test_for_hook_forward(xin, w1, b1, w2, b2)
        jax.block_until_ready(relu6)
        jax.block_until_ready(layers_in)
        jax.block_until_ready(layers_out)

        lin1_ref, lin2_ref, relu_ref, relu6_ref = reference(xin)
        assert jnp.allclose(layers_out[0], lin1_ref, atol=1e-5)
        assert jnp.allclose(layers_out[1], lin2_ref, atol=1e-5)
        assert jnp.allclose(layers_out[2], relu_ref, atol=1e-5)
        assert jnp.allclose(relu6, relu6_ref, atol=1e-5)
        assert layers_in[0].shape == xin.shape
        assert layers_in[1].shape == (xin.shape[0], 2)
        assert layers_in[2].shape == (xin.shape[0], 1)

    print("KERNEL_OK")
</pallas_src>

<mosaic_0001>
module attributes {stable_mosaic.version = 11 : i64} {
  func.func @_testforhook_kernel(%arg0: i32, %arg1: memref<9xf32, #tpu.memory_space<smem>>, %arg2: memref<2x8x128xf32, #tpu.memory_space<vmem>>, %arg3: memref<5x8x128xf32, #tpu.memory_space<vmem>>) attributes {dimension_semantics = [#tpu.dimension_semantics<parallel>], iteration_bounds = array<i64: 1>, scalar_prefetch = 0 : i64, scratch_operands = 0 : i64, tpu.core_type = #tpu.core_type<tc>, window_params = [{transform_indices = @transform_0, window_bounds = array<i64: 9>}, {transform_indices = @transform_1, window_bounds = array<i64: 2, 8, 128>}, {transform_indices = @transform_2, window_bounds = array<i64: 5, 8, 128>}]} {
    %c0 = arith.constant 0 : index
    %c0_0 = arith.constant 0 : index
    %c0_1 = arith.constant 0 : index
    %0 = vector.load %arg2[%c0, %c0_0, %c0_1] : memref<2x8x128xf32, #tpu.memory_space<vmem>>, vector<1x8x128xf32>
    %1 = vector.shape_cast %0 : vector<1x8x128xf32> to vector<8x128xf32>
    %c1 = arith.constant 1 : index
    %c0_2 = arith.constant 0 : index
    %c0_3 = arith.constant 0 : index
    %2 = vector.load %arg2[%c1, %c0_2, %c0_3] : memref<2x8x128xf32, #tpu.memory_space<vmem>>, vector<1x8x128xf32>
    %3 = vector.shape_cast %2 : vector<1x8x128xf32> to vector<8x128xf32>
    %c0_4 = arith.constant 0 : index
    %4 = memref.load %arg1[%c0_4] : memref<9xf32, #tpu.memory_space<smem>>
    %c1_5 = arith.constant 1 : index
    %5 = memref.load %arg1[%c1_5] : memref<9xf32, #tpu.memory_space<smem>>
    %c2 = arith.constant 2 : index
    %6 = memref.load %arg1[%c2] : memref<9xf32, #tpu.memory_space<smem>>
    %c3 = arith.constant 3 : index
    %7 = memref.load %arg1[%c3] : memref<9xf32, #tpu.memory_space<smem>>
    %c4 = arith.constant 4 : index
    %8 = memref.load %arg1[%c4] : memref<9xf32, #tpu.memory_space<smem>>
    %c5 = arith.constant 5 : index
    %9 = memref.load %arg1[%c5] : memref<9xf32, #tpu.memory_space<smem>>
    %c6 = arith.constant 6 : index
    %10 = memref.load %arg1[%c6] : memref<9xf32, #tpu.memory_space<smem>>
    %c7 = arith.constant 7 : index
    %11 = memref.load %arg1[%c7] : memref<9xf32, #tpu.memory_space<smem>>
    %c8 = arith.constant 8 : index
    %12 = memref.load %arg1[%c8] : memref<9xf32, #tpu.memory_space<smem>>
    %13 = vector.broadcast %4 : f32 to vector<8x128xf32>
    %14 = arith.mulf %1, %13 : vector<8x128xf32>
    %15 = vector.broadcast %5 : f32 to vector<8x128xf32>
    %16 = arith.mulf %3, %15 : vector<8x128xf32>
    %17 = arith.addf %14, %16 : vector<8x128xf32>
    %18 = vector.broadcast %8 : f32 to vector<8x128xf32>
    %19 = arith.addf %17, %18 : vector<8x128xf32>
    %20 = vector.broadcast %6 : f32 to vector<8x128xf32>
    %21 = arith.mulf %1, %20 : vector<8x128xf32>
    %22 = vector.broadcast %7 : f32 to vector<8x128xf32>
    %23 = arith.mulf %3, %22 : vector<8x128xf32>
    %24 = arith.addf %21, %23 : vector<8x128xf32>
    %25 = vector.broadcast %9 : f32 to vector<8x128xf32>
    %26 = arith.addf %24, %25 : vector<8x128xf32>
    %27 = vector.broadcast %10 : f32 to vector<8x128xf32>
    %28 = arith.mulf %19, %27 : vector<8x128xf32>
    %29 = vector.broadcast %11 : f32 to vector<8x128xf32>
    %30 = arith.mulf %26, %29 : vector<8x128xf32>
    %31 = arith.addf %28, %30 : vector<8x128xf32>
    %32 = vector.broadcast %12 : f32 to vector<8x128xf32>
    %33 = arith.addf %31, %32 : vector<8x128xf32>
    %cst = arith.constant 0.000000e+00 : f32
    %34 = vector.broadcast %cst : f32 to vector<8x128xf32>
    %35 = arith.maximumf %33, %34 : vector<8x128xf32>
    %cst_6 = arith.constant 6.000000e+00 : f32
    %36 = vector.broadcast %cst_6 : f32 to vector<8x128xf32>
    %37 = arith.minimumf %35, %36 : vector<8x128xf32>
    %c0_7 = arith.constant 0 : index
    %c0_8 = arith.constant 0 : index
    %c0_9 = arith.constant 0 : index
    %38 = vector.load %arg3[%c0_7, %c0_8, %c0_9] : memref<5x8x128xf32, #tpu.memory_space<vmem>>, vector<1x8x128xf32>
    %39 = vector.shape_cast %38 : vector<1x8x128xf32> to vector<8x128xf32>
    %40 = vector.shape_cast %19 : vector<8x128xf32> to vector<1x8x128xf32>
    tpu.vector_store %arg3[%c0_7, %c0_8, %c0_9], %40 {strides = array<i32>} : memref<5x8x128xf32, #tpu.memory_space<vmem>>, vector<1x8x128xf32>,
    %c1_10 = arith.constant 1 : index
    %c0_11 = arith.constant 0 : index
    %c0_12 = arith.constant 0 : index
    %41 = vector.load %arg3[%c1_10, %c0_11, %c0_12] : memref<5x8x128xf32, #tpu.memory_space<vmem>>, vector<1x8x128xf32>
    %42 = vector.shape_cast %41 : vector<1x8x128xf32> to vector<8x128xf32>
    %43 = vector.shape_cast %26 : vector<8x128xf32> to vector<1x8x128xf32>
    tpu.vector_store %arg3[%c1_10, %c0_11, %c0_12], %43 {strides = array<i32>} : memref<5x8x128xf32, #tpu.memory_space<vmem>>, vector<1x8x128xf32>,
    %c2_13 = arith.constant 2 : index
    %c0_14 = arith.constant 0 : index
    %c0_15 = arith.constant 0 : index
    %44 = vector.load %arg3[%c2_13, %c0_14, %c0_15] : memref<5x8x128xf32, #tpu.memory_space<vmem>>, vector<1x8x128xf32>
    %45 = vector.shape_cast %44 : vector<1x8x128xf32> to vector<8x128xf32>
    %46 = vector.shape_cast %33 : vector<8x128xf32> to vector<1x8x128xf32>
    tpu.vector_store %arg3[%c2_13, %c0_14, %c0_15], %46 {strides = array<i32>} : memref<5x8x128xf32, #tpu.memory_space<vmem>>, vector<1x8x128xf32>,
    %c3_16 = arith.constant 3 : index
    %c0_17 = arith.constant 0 : index
    %c0_18 = arith.constant 0 : index
    %47 = vector.load %arg3[%c3_16, %c0_17, %c0_18] : memref<5x8x128xf32, #tpu.memory_space<vmem>>, vector<1x8x128xf32>
    %48 = vector.shape_cast %47 : vector<1x8x128xf32> to vector<8x128xf32>
    %49 = vector.shape_cast %35 : vector<8x128xf32> to vector<1x8x128xf32>
    tpu.vector_store %arg3[%c3_16, %c0_17, %c0_18], %49 {strides = array<i32>} : memref<5x8x128xf32, #tpu.memory_space<vmem>>, vector<1x8x128xf32>,
    %c4_19 = arith.constant 4 : index
    %c0_20 = arith.constant 0 : index
    %c0_21 = arith.constant 0 : index
    %50 = vector.load %arg3[%c4_19, %c0_20, %c0_21] : memref<5x8x128xf32, #tpu.memory_space<vmem>>, vector<1x8x128xf32>
    %51 = vector.shape_cast %50 : vector<1x8x128xf32> to vector<8x128xf32>
    %52 = vector.shape_cast %37 : vector<8x128xf32> to vector<1x8x128xf32>
    tpu.vector_store %arg3[%c4_19, %c0_20, %c0_21], %52 {strides = array<i32>} : memref<5x8x128xf32, #tpu.memory_space<vmem>>, vector<1x8x128xf32>,
    return
  }
  func.func @transform_0(%arg0: i32) -> i32 {
    %c0_i32 = arith.constant 0 : i32
    %c0_i32_0 = arith.constant 0 : i32
    return %c0_i32 : i32
  }
  func.func @transform_1(%arg0: i32) -> (i32, i32, i32) {
    %c0_i32 = arith.constant 0 : i32
    %c0_i32_0 = arith.constant 0 : i32
    %c0_i32_1 = arith.constant 0 : i32
    return %c0_i32, %arg0, %c0_i32_0 : i32, i32, i32
  }
  func.func @transform_2(%arg0: i32) -> (i32, i32, i32) {
    %c0_i32 = arith.constant 0 : i32
    %c0_i32_0 = arith.constant 0 : i32
    %c0_i32_1 = arith.constant 0 : i32
    return %c0_i32, %arg0, %c0_i32_0 : i32, i32, i32
  }
}

</mosaic_0001>

<bundles_post_ra>
// kernel: tpu_custom_call.1
= control target key start
LH: loop header
LB: loop body
LE: loop exit
PB: predicated region body
PF: predicated region fallthrough
CT: control target
= control target key end

     0   :  { %7 = vsyncpa [#allocation5], 0  ;;  %s201_s0 = inlined_call_operand.hbm [shape: f32[9], index: 0, kind: input, shape index: {}]   ;;  %s202_s1 = inlined_call_operand.hbm [shape: f32[2,8,128], index: 1, kind: input, shape index: {}]   ;;  %s203_s2 = inlined_call_operand.hbm [shape: f32[5,8,128], index: 2, kind: output, shape index: {}]  }
   0x1   :  { %8 = vsyncpa [#allocation3], 0 }
   0x2   :  { %9 = vsyncpa [#allocation4], 0  ;;  %s166_s9 = smov [#allocation2]   ;;  %s167_s12 = smov [#allocation6]  }
   0x3   :  { %17 = dma.hbm_to_smem %s201_s0, 16, %s166_s9, [#allocation5]  }
   0x4   :  { %s23_s13 = sshll.u32 %s167_s12, 4  ;;  %s24_s13 = int_to_ptr.vmem [resolvable:$true] %s23_s13 }
   0x5   :  { %s128_s14 = scalar_lea.vmem %s24_s13, 256  ;;  %p133_p1 = scmp.lt.s32.totalorder %s24_s13, %s24_s13 }
   0x6   :  { %p129_p0 = scmp.ne.s32.totalorder %s24_s13, %s128_s14  ;;  %p134_p2 = scmp.lt.s32.totalorder %s128_s14, %s128_s14 }
   0x8   :  { %p135_p3 = por %p134_p2, %p133_p1 }
   0xa   :  { %p136_p4 = pnand %p135_p3, %p129_p0 }
   0xc   :  { %139 = shalt.err (!%p136_p4)
}
   0xd   :  { %s168_s15 = smov 128   ;;  %s169_s16 = smov 8  }
   0xe   :  { %29 = dma.hbm_to_vmem [thread:$0]  %s202_s1, 256, %s24_s13, [#allocation3], %s168_s15, %s168_s15, %s169_s16  }
   0xf   :  { %160 = dma.done.wait [#allocation5], 16  }
  0x10   :  { %161 = vsyncadd [#allocation5], 4294967280 }
  0x11   :  { %162 = dma.done.wait [#allocation3], 256  }
  0x12   :  { %163 = vsyncadd [#allocation3], 4294967040 }
  0x13   :  { %36 = sfence }
  0x14   :  { %s40_s0 = sld [smem:[#allocation2]]  ;;  %v37_v0 = vld [vmem:[#allocation6] sm:$0xff]  ;;  %v39_v1 = vld [vmem:[#allocation6 + $0x8] sm:$0xff]  ;;  %s170_s26 = smov [#allocation7]  }
  0x15   :  { %s99_s19 = sld [smem:[#allocation2 + $0x1]]  ;;  %s86_s27 = sshll.u32 %s170_s26, 4  ;;  %s87_s27 = int_to_ptr.vmem [resolvable:$true] %s86_s27 }
  0x16   :  { %s102_s20 = sld [smem:[#allocation2 + $0x4]]  ;;  %s140_s28 = scalar_lea.vmem %s87_s27, 640 }
  0x17   :  { %s104_s21 = sld [smem:[#allocation2 + $0x6]]  ;;  %p141_p5 = scmp.ne.s32.totalorder %s87_s27, %s140_s28 }
  0x18   :  { %s100_s22 = sld [smem:[#allocation2 + $0x2]]  ;;  %p145_p6 = scmp.lt.s32.totalorder %s87_s27, %s87_s27 }
  0x19   :  { %s101_s23 = sld [smem:[#allocation2 + $0x3]]  ;;  %p146_p7 = scmp.lt.s32.totalorder %s140_s28, %s140_s28 }
  0x1a   :  { %v49_v2 = vstv %s40_s0  ;;  %s103_s24 = sld [smem:[#allocation2 + $0x5]] }
  0x1b   :  { %v50_v3 = vmul.f32 %v49_v2, %v37_v0  ;;  %v51_v4 = vstv %s99_s19  ;;  %s105_s25 = sld [smem:[#allocation2 + $0x7]]  ;;  %p147_p8 = por %p146_p7, %p145_p6 }
  0x1c   :  { %v52_v5 = vmul.f32 %v51_v4, %v39_v1  ;;  %v54_v6 = vstv %s102_s20  ;;  %s106_s1 = sld [smem:[#allocation2 + $0x8]] }
  0x1d   :  { %v63_v13 = vstv %s104_s21  ;;  %p148_p9 = pnand %p147_p8, %p141_p5 }
  0x1e   :  { %v53_v7 = vadd.f32 %v52_v5, %v50_v3  ;;  %v56_v8 = vstv %s100_s22 }
  0x1f   :  { %v57_v9 = vmul.f32 %v56_v8, %v37_v0  ;;  %v58_v10 = vstv %s101_s23 }
  0x20   :  { %v55_v11 = vadd.f32 %v54_v6, %v53_v7  ;;  %v59_v12 = vmul.f32 %v58_v10, %v39_v1  ;;  %v61_v14 = vstv %s103_s24 }
  0x21   :  { %v65_v16 = vstv %s105_s25 }
  0x22   :  { %72 = vst [vmem:[#allocation7] sm:$0xff] %v55_v11  ;;  %v60_v15 = vadd.f32 %v59_v12, %v57_v9  ;;  %v64_v17 = vmul.f32 %v63_v13, %v55_v11  ;;  %v68_v20 = vstv %s106_s1 }
  0x24   :  { %v62_v18 = vadd.f32 %v61_v14, %v60_v15 }
  0x26   :  { %v66_v19 = vmul.f32 %v65_v16, %v62_v18  ;;  %74 = vst [vmem:[#allocation7 + $0x8] sm:$0xff] %v62_v18 }
  0x28   :  { %v67_v21 = vadd.f32 %v66_v19, %v64_v17 }
  0x2a   :  { %v69_v22 = vadd.f32 %v68_v20, %v67_v21 }
  0x2c   :  { %76 = vst [vmem:[#allocation7 + $0x10] sm:$0xff] %v69_v22  ;;  %v70_v23 = vmax.f32 %v69_v22, 0.0 }
  0x2e   :  { %78 = vst [vmem:[#allocation7 + $0x18] sm:$0xff] %v70_v23  ;;  %v71_v24 = vmin.f32 %v70_v23, 6.0 }
  0x30   :  { %80 = vst [vmem:[#allocation7 + $0x20] sm:$0xff] %v71_v24 }
  0x31   :  { %151 = shalt.err (!%p148_p9)
}
  0x32   :  { %92 = dma.vmem_to_hbm [thread:$0]  %s87_s27, 640, %s203_s2, [#allocation4], %s168_s15, %s168_s15, %s169_s16  }
  0x33   :  { %164 = dma.done.wait [#allocation4], 640  }
  0x34   :  { %165 = vsyncadd [#allocation4], 4294966656 }
  0x35   :  { %96 = vsyncpa [#allocation3], 1 }
  0x36   :  { %97 = vsyncpa [#allocation4], 1 }
  0x37   :  { %98 = vsyncpa [#allocation5], 1 }

</bundles_post_ra>
